<compile_context>
chip_gen: v6e
topology: v6e:2x2x1
jax: 0.10.0
libtpu: 0.0.40
codegen_flags: <defaults>
</compile_context>

<pallas_src>
import functools

import jax
import jax.numpy as jnp
from jax.experimental import pallas as pl
from jax.experimental.pallas import tpu as pltpu


def _round_up(x, m):
    return (x + m - 1) // m * m


def _cdiv(a, b):
    return (a + b - 1) // b


def _sublane_multiple(dtype):
    nbytes = jnp.dtype(dtype).itemsize
    return {4: 8, 2: 16, 1: 32}.get(nbytes, 8)


def _vmem_capacity_bytes():
    """Generation-aware VMEM capacity (v5e/v6e: 128 MiB, v7x: 64 MiB per TC)."""
    try:
        info = pltpu.get_tpu_info()
        for name in ("vmem_capacity_bytes", "vmem_bytes", "vmem_size_bytes"):
            cap = getattr(info, name, None)
            if cap:
                return int(cap)
    except Exception:
        pass
    return 64 << 20          # conservative fallback (v7x per-TensorCore)


# ----------------------------- Pallas kernel ------------------------------- #
def _loki_matmul_kernel(x_ref, wt_ref, b_ref, o_ref, acc_ref):
    # x_ref  : (tm, tk)  input row/K tile
    # wt_ref : (tk, tn)  weight tile (columns already in original output order)
    # b_ref  : (1, tn)   f32 bias tile
    # o_ref  : (tm, tn)  output tile
    # acc_ref: (tm, tn)  f32 accumulator (VMEM scratch, lives across K steps)
    k = pl.program_id(2)

    @pl.when(k == 0)
    def _():
        acc_ref[...] = jnp.zeros_like(acc_ref)

    acc_ref[...] += jnp.dot(x_ref[...], wt_ref[...],
                            preferred_element_type=jnp.float32)

    @pl.when(k == pl.num_programs(2) - 1)
    def _():
        o_ref[...] = (acc_ref[...] + b_ref[...]).astype(o_ref.dtype)


# ------------------------ one-time parameter prep --------------------------- #
def prepare_loki_params(w_active, w_frozen, b_active, b_frozen, index_map,
                        compute_dtype=None):
    """Fold the LoKI output permutation into the weight columns (done once).

    Returns (w_pad (IN_p, OUT_p), b_pad (1, OUT_p) f32, out_features).
    """
    OUT = w_active.shape[0] + w_frozen.shape[0]
    IN = w_active.shape[1]

    w_cat = jnp.concatenate([w_active, w_frozen], axis=0)            # (OUT, IN)
    # LoKI forward: y[..., o] = (x @ w_cat.T + b_cat)[..., index_map[o]]
    #   => permute rows once and transpose, so the kernel needs no gather.
    w_perm_t = jnp.take(w_cat, index_map, axis=0).T                  # (IN, OUT)
    if compute_dtype is not None:
        w_perm_t = w_perm_t.astype(compute_dtype)

    if (b_active is None) != (b_frozen is None):
        raise ValueError("active/frozen bias must both be set or both be None")
    if b_active is not None:
        b_cat = jnp.concatenate([b_active, b_frozen], axis=0)
        b_perm = jnp.take(b_cat, index_map, axis=0).astype(jnp.float32)
    else:
        b_perm = jnp.zeros((OUT,), dtype=jnp.float32)

    # Pad K (in_features) to a multiple of 256 (full MXU passes on v6e/v7x) and
    # N (out_features) to a tile-friendly multiple so tn in {128..2048} divides.
    IN_p = _round_up(IN, 256)
    OUT_p = _round_up(OUT, 128) if OUT <= 512 else _round_up(OUT, 512)

    w_pad = jnp.pad(w_perm_t, ((0, IN_p - IN), (0, OUT_p - OUT)))
    b_pad = jnp.pad(b_perm, (0, OUT_p - OUT))[None, :]               # (1, OUT_p)
    return w_pad, b_pad, OUT


# ------------------------------ forward pass -------------------------------- #
@functools.partial(jax.jit, static_argnames=("out_features",))
def loki_linear_forward(x, w_pad, b_pad, *, out_features):
    """LoKILinear.forward:  y = x @ W.T + b  with W/b given pre-permuted/padded.

    x       : (B, S, IN)
    w_pad   : (IN_p, OUT_p)   padded, columns in original output order
    b_pad   : (1, OUT_p)      f32, padded
    returns : (B, S, out_features)   (dtype of x)
    """
    B, S, IN = x.shape
    IN_p, OUT_p = w_pad.shape
    M = B * S
    out_dtype = x.dtype

    xb = jnp.dtype(w_pad.dtype).itemsize       # compute dtype bytes
    wb = xb
    ob = jnp.dtype(out_dtype).itemsize
    sub = _sublane_multiple(w_pad.dtype)

    cap = _vmem_capacity_bytes()
    budget = int(cap * 0.55)                    # ~70 MiB v5e/v6e, ~35 MiB v7x

    # ---- tn: keep the output lane dimension wide.  Must divide OUT_p.
    tn_cands = sorted({t for t in (128, 256, 384, 512, 1024, 2048, OUT_p)
                       if t <= OUT_p and OUT_p % t == 0 and t % 128 == 0},
                      reverse=True)
    small_m = M <= 128                          # GEMV-like / decode regime
    tn_cap = 2048 if small_m else 512
    tn = next((t for t in tn_cands if t <= tn_cap), tn_cands[-1])

    tm = min(512, _round_up(M, sub))
    tk = IN_p

    def footprint(tm_, tk_, tn_):
        # double-buffered in/out/bias tiles + single f32 accumulator scratch
        return (2 * (tm_ * tk_ * xb + tk_ * tn_ * wb + tm_ * tn_ * ob + tn_ * 4)
                + tm_ * tn_ * 4)

    # Shrink order chosen for HBM traffic:
    # 1) tm down to 256 (free: no extra traffic, MXU still fed full passes).
    while footprint(tm, tk, tn) > budget and tm > 256:
        tm = max(256, _round_up(tm // 2, sub))
    # 2) K-tiling (tk): keeps tn wide; weight is re-streamed per M tile but the
    #    x stream keeps ~2*tn flop/byte arithmetic intensity.
    while footprint(tm, tk, tn) > budget and tk > 256 and (tk // 2) % 128 == 0:
        tk //= 2
    # 3) last resorts: tm down to one sublane group, then a narrower tn.
    while footprint(tm, tk, tn) > budget and tm > sub:
        tm = max(sub, _round_up(tm // 2, sub))
    while footprint(tm, tk, tn) > budget and tn > tn_cands[-1]:
        tn = next(t for t in tn_cands if t < tn)

    # Rebalance tm: same number of grid steps, M padding < one sublane group.
    num_m = _cdiv(M, tm)
    tm = _round_up(_cdiv(M, num_m), sub)
    M_p = num_m * tm

    num_n = OUT_p // tn
    num_k = IN_p // tk
    grid = (num_n, num_m, num_k)       # N outer (TC split), M middle, K inner

    x2d = x.reshape(M, IN)
    if x2d.dtype != w_pad.dtype:
        x2d = x2d.astype(w_pad.dtype)
    if M_p != M or IN_p != IN:
        x2d = jnp.pad(x2d, ((0, M_p - M), (0, IN_p - IN)))

    # HBM traffic of this schedule: x re-streamed once per N tile; weight read
    # once when K fits a single tile (weight-resident over the inner M loop),
    # else once per M tile; output written once; bias once per N tile.
    w_restream = 1 if num_k == 1 else num_m
    cost = pl.CostEstimate(
        flops=2 * M_p * IN_p * OUT_p,
        transcendentals=0,
        bytes_accessed=(num_n * M_p * IN_p * xb
                        + w_restream * IN_p * OUT_p * wb
                        + M_p * OUT_p * ob
                        + OUT_p * 4),
    )

    vmem_limit = int(min(int(cap * 0.9),
                         max(32 << 20, footprint(tm, tk, tn) + (8 << 20))))

    # TODO(synk): when num_k == 1 and num_m is large, sweep
    # pipeline_mode=pl.Buffered(1) on the weight BlockSpec (its second buffer
    # is idle across the inner M loop) and pl.Buffered(3) on x for tiny-M
    # decode shapes.
    out2d = pl.pallas_call(
        _loki_matmul_kernel,
        out_shape=jax.ShapeDtypeStruct((M_p, OUT_p), out_dtype),
        grid_spec=pltpu.PrefetchScalarGridSpec(
            num_scalar_prefetch=0,
            grid=grid,
            in_specs=[
                pl.BlockSpec((tm, tk), lambda j, i, k: (i, k)),
                pl.BlockSpec((tk, tn), lambda j, i, k: (k, j)),
                pl.BlockSpec((1, tn), lambda j, i, k: (0, j)),
            ],
            out_specs=pl.BlockSpec((tm, tn), lambda j, i, k: (i, j)),
            scratch_shapes=[pltpu.VMEM((tm, tn), jnp.float32)],
        ),
        compiler_params=pltpu.CompilerParams(
            # N is the only "parallel" axis: on v7x the 2-TensorCore split
            # lands on N, adding no extra weight HBM reads under this schedule.
            dimension_semantics=("parallel", "arbitrary", "arbitrary"),
            vmem_limit_bytes=vmem_limit),
        cost_estimate=cost,
    )(x2d, w_pad, b_pad)

    return out2d[:M, :out_features].reshape(B, S, out_features)


# ------------------------------- main / test -------------------------------- #
if __name__ == "__main__":
    key = jax.random.PRNGKey(0)

    B, S = 2, 8
    IN, OUT = 32, 32
    active_pos = sorted([1, 5, 7, 10, 14, 21, 30])            # the "target_pos"
    frozen_pos = [i for i in range(OUT) if i not in active_pos]

    k_w, k_b, k_x = jax.random.split(key, 3)
    W = jax.random.normal(k_w, (OUT, IN), dtype=jnp.float32) * 0.1
    b = jax.random.normal(k_b, (OUT,), dtype=jnp.float32) * 0.1
    x = jax.random.normal(k_x, (B, S, IN), dtype=jnp.float32)

    active_pos_arr = jnp.array(active_pos, dtype=jnp.int32)
    frozen_pos_arr = jnp.array(frozen_pos, dtype=jnp.int32)

    w_active = W[active_pos_arr]          # (n_active, IN)
    w_frozen = W[frozen_pos_arr]          # (n_frozen, IN)
    b_active = b[active_pos_arr]
    b_frozen = b[frozen_pos_arr]

    # index_map: original position -> slot in concatenated [active ++ frozen].
    index_map = jnp.zeros((OUT,), dtype=jnp.int32)
    index_map = index_map.at[active_pos_arr].set(
        jnp.arange(len(active_pos), dtype=jnp.int32))
    index_map = index_map.at[frozen_pos_arr].set(
        jnp.arange(len(frozen_pos), dtype=jnp.int32) + len(active_pos))

    # One-time prep (hoisted out of the per-call path), then the kernel call.
    w_pad, b_pad, out_features = prepare_loki_params(
        w_active, w_frozen, b_active, b_frozen, index_map)

    out = loki_linear_forward(x, w_pad, b_pad, out_features=out_features)
    out = jax.block_until_ready(out)

    # Reference: LoKILinear.forward is mathematically identical to x @ W.T + b.
    ref = jnp.einsum("bsi,oi->bso", x, W) + b[None, None, :]
    assert out.shape == (B, S, OUT)
    assert jnp.allclose(out, ref, atol=1e-5, rtol=1e-5), "mismatch vs reference"

    print("KERNEL_OK")
</pallas_src>

<mosaic_0001>
module attributes {stable_mosaic.version = 11 : i64} {
  func.func @_loki_matmul_kernel(%arg0: i32, %arg1: i32, %arg2: i32, %arg3: memref<16x256xf32, #tpu.memory_space<vmem>>, %arg4: memref<256x128xf32, #tpu.memory_space<vmem>>, %arg5: memref<1x128xf32, #tpu.memory_space<vmem>>, %arg6: memref<16x128xf32, #tpu.memory_space<vmem>>, %arg7: memref<16x128xf32, #tpu.memory_space<vmem>>) attributes {dimension_semantics = [#tpu.dimension_semantics<parallel>, #tpu.dimension_semantics<arbitrary>, #tpu.dimension_semantics<arbitrary>], iteration_bounds = array<i64: 1, 1, 1>, scalar_prefetch = 0 : i64, scratch_operands = 1 : i64, tpu.core_type = #tpu.core_type<tc>, window_params = [{transform_indices = @transform_0, window_bounds = array<i64: 16, 256>}, {transform_indices = @transform_1, window_bounds = array<i64: 256, 128>}, {transform_indices = @transform_2, window_bounds = array<i64: 1, 128>}, {transform_indices = @transform_3, window_bounds = array<i64: 16, 128>}]} {
    %c0_i32 = arith.constant 0 : i32
    %0 = arith.cmpi eq, %arg2, %c0_i32 : i32
    %1 = arith.extui %0 : i1 to i32
    %c0_i32_0 = arith.constant 0 : i32
    %2 = arith.cmpi ne, %1, %c0_i32_0 : i32
    scf.if %2 {
      %cst_10 = arith.constant 0.000000e+00 : f32
      %12 = vector.broadcast %cst_10 : f32 to vector<16x128xf32>
      %c0_11 = arith.constant 0 : index
      %c0_12 = arith.constant 0 : index
      %13 = vector.load %arg7[%c0_11, %c0_12] : memref<16x128xf32, #tpu.memory_space<vmem>>, vector<16x128xf32>
      tpu.vector_store %arg7[%c0_11, %c0_12], %12 {strides = array<i32>} : memref<16x128xf32, #tpu.memory_space<vmem>>, vector<16x128xf32>,
    } else {
    }
    %c0 = arith.constant 0 : index
    %c0_1 = arith.constant 0 : index
    %3 = vector.load %arg7[%c0, %c0_1] : memref<16x128xf32, #tpu.memory_space<vmem>>, vector<16x128xf32>
    %c0_2 = arith.constant 0 : index
    %c0_3 = arith.constant 0 : index
    %4 = vector.load %arg3[%c0_2, %c0_3] : memref<16x256xf32, #tpu.memory_space<vmem>>, vector<16x256xf32>
    %c0_4 = arith.constant 0 : index
    %c0_5 = arith.constant 0 : index
    %5 = vector.load %arg4[%c0_4, %c0_5] : memref<256x128xf32, #tpu.memory_space<vmem>>, vector<256x128xf32>
    %cst = arith.constant dense<0.000000e+00> : vector<16x128xf32>
    %6 = tpu.matmul %4, %5, %cst {dimension_numbers = #tpu.dot_dimension_numbers<[1], [0], [0], [1], [0, 0, 1, 1], [], []>} : vector<16x256xf32>, vector<256x128xf32>, vector<16x128xf32> -> vector<16x128xf32>
    %7 = arith.addf %3, %6 : vector<16x128xf32>
    %c0_6 = arith.constant 0 : index
    %c0_7 = arith.constant 0 : index
    %8 = vector.load %arg7[%c0_6, %c0_7] : memref<16x128xf32, #tpu.memory_space<vmem>>, vector<16x128xf32>
    tpu.vector_store %arg7[%c0_6, %c0_7], %7 {strides = array<i32>} : memref<16x128xf32, #tpu.memory_space<vmem>>, vector<16x128xf32>,
    %c0_i32_8 = arith.constant 0 : i32
    %9 = arith.cmpi eq, %arg2, %c0_i32_8 : i32
    %10 = arith.extui %9 : i1 to i32
    %c0_i32_9 = arith.constant 0 : i32
    %11 = arith.cmpi ne, %10, %c0_i32_9 : i32
    scf.if %11 {
      %c0_10 = arith.constant 0 : index
      %c0_11 = arith.constant 0 : index
      %12 = vector.load %arg7[%c0_10, %c0_11] : memref<16x128xf32, #tpu.memory_space<vmem>>, vector<16x128xf32>
      %c0_12 = arith.constant 0 : index
      %c0_13 = arith.constant 0 : index
      %13 = vector.load %arg5[%c0_12, %c0_13] : memref<1x128xf32, #tpu.memory_space<vmem>>, vector<1x128xf32>
      %14 = vector.broadcast %13 : vector<1x128xf32> to vector<16x128xf32>
      %15 = arith.addf %12, %14 : vector<16x128xf32>
      %c0_14 = arith.constant 0 : index
      %c0_15 = arith.constant 0 : index
      %16 = vector.load %arg6[%c0_14, %c0_15] : memref<16x128xf32, #tpu.memory_space<vmem>>, vector<16x128xf32>
      tpu.vector_store %arg6[%c0_14, %c0_15], %15 {strides = array<i32>} : memref<16x128xf32, #tpu.memory_space<vmem>>, vector<16x128xf32>,
    } else {
    }
    return
  }
  func.func @transform_0(%arg0: i32, %arg1: i32, %arg2: i32) -> (i32, i32) {
    %c0_i32 = arith.constant 0 : i32
    return %arg1, %arg2 : i32, i32
  }
  func.func @transform_1(%arg0: i32, %arg1: i32, %arg2: i32) -> (i32, i32) {
    %c0_i32 = arith.constant 0 : i32
    return %arg2, %arg0 : i32, i32
  }
  func.func @transform_2(%arg0: i32, %arg1: i32, %arg2: i32) -> (i32, i32) {
    %c0_i32 = arith.constant 0 : i32
    %c0_i32_0 = arith.constant 0 : i32
    return %c0_i32, %arg0 : i32, i32
  }
  func.func @transform_3(%arg0: i32, %arg1: i32, %arg2: i32) -> (i32, i32) {
    %c0_i32 = arith.constant 0 : i32
    return %arg1, %arg0 : i32, i32
  }
}

</mosaic_0001>

<bundles_post_ra>
// kernel: loki_linear_forward.1
= control target key start
LH: loop header
LB: loop body
LE: loop exit
PB: predicated region body
PF: predicated region fallthrough
CT: control target
= control target key end

     0   :  { %8 = vsyncpa [#allocation4], 0  ;;  %s268_s12 = smov [#allocation3]   ;;  %s315_s0 = inlined_call_operand.vmem [shape: f32[16,256], index: 0, kind: input, shape index: {}]   ;;  %s316_s1 = inlined_call_operand.hbm [shape: f32[256,128], index: 1, kind: input, shape index: {}]   ;;  %s317_s2 = inlined_call_operand.vmem [shape: f32[1,128], index: 2, kind: input, shape index: {}]   ;;  %s318_s3 = inlined_call_operand.vmem [shape: f32[16,128], index: 3, kind: output, shape index: {}]  }
   0x1   :  { %s16_s13 = sshll.u32 %s268_s12, 4  ;;  %s17_s13 = int_to_ptr.vmem [resolvable:$true] %s16_s13 }
   0x2   :  { %s254_s14 = scalar_lea.vmem %s17_s13, 4096  ;;  %p259_p1 = scmp.lt.s32.totalorder %s17_s13, %s17_s13 }
   0x3   :  { %p255_p0 = scmp.ne.s32.totalorder %s17_s13, %s254_s14  ;;  %p260_p2 = scmp.lt.s32.totalorder %s254_s14, %s254_s14 }
   0x5   :  { %p261_p3 = por %p260_p2, %p259_p1 }
   0x7   :  { %p262_p4 = pnand %p261_p3, %p255_p0 }
   0x9   :  { %265 = shalt.err (!%p262_p4)
}
   0xa   :  { %s269_s15 = smov 128   ;;  %s270_s16 = smov 8  }
   0xb   :  { %22 = dma.hbm_to_vmem [thread:$0]  %s316_s1, 4096, %s17_s13, [#allocation4], %s269_s15, %s269_s15, %s270_s16  }
   0xc   :  { %266 = dma.done.wait [#allocation4], 4096  }
   0xd   :  { %267 = vsyncadd [#allocation4], 4294963200  ;;  %v71_v0 = vld [vmem:[#allocation3 + $0xf8] sm:$0xff]  ;;  %v70_v2 = vld [vmem:[#allocation3 + $0xf0] sm:$0xff] }
   0xe   :  { %v55_v1 = vld [vmem:[#allocation3 + $0x78] sm:$0xff]  ;;  %173 = vmatprep.subr.mxu0 %v71_v0  ;;  %211 = vmatprep.subr.mxu1 %v71_v0  ;;  %v54_v3 = vld [vmem:[#allocation3 + $0x70] sm:$0xff]  ;;  %v69_v4 = vld [vmem:[#allocation3 + $0xe8] sm:$0xff] }
   0xf   :  { %174 = vmatpush3.msra.mxu0 %v55_v1  ;;  %227 = vmatpush3.msra.mxu1 %v55_v1  ;;  %v53_v5 = vld [vmem:[#allocation3 + $0x68] sm:$0xff]  ;;  %v68_v6 = vld [vmem:[#allocation3 + $0xe0] sm:$0xff]  ;;  %v67_v8 = vld [vmem:[#allocation3 + $0xd8] sm:$0xff] }
  0x10   :  { %175 = vmatprep.subr.mxu0 %v70_v2  ;;  %212 = vmatprep.subr.mxu1 %v70_v2  ;;  %v52_v7 = vld [vmem:[#allocation3 + $0x60] sm:$0xff]  ;;  %v51_v9 = vld [vmem:[#allocation3 + $0x58] sm:$0xff]  ;;  %v66_v10 = vld [vmem:[#allocation3 + $0xd0] sm:$0xff] }
  0x11   :  { %176 = vmatpush3.msra.mxu0 %v54_v3  ;;  %228 = vmatpush3.msra.mxu1 %v54_v3  ;;  %v50_v11 = vld [vmem:[#allocation3 + $0x50] sm:$0xff]  ;;  %v65_v12 = vld [vmem:[#allocation3 + $0xc8] sm:$0xff]  ;;  %v64_v14 = vld [vmem:[#allocation3 + $0xc0] sm:$0xff] }
  0x12   :  { %177 = vmatprep.subr.mxu0 %v69_v4  ;;  %213 = vmatprep.subr.mxu1 %v69_v4  ;;  %v49_v13 = vld [vmem:[#allocation3 + $0x48] sm:$0xff]  ;;  %v48_v15 = vld [vmem:[#allocation3 + $0x40] sm:$0xff]  ;;  %v63_v16 = vld [vmem:[#allocation3 + $0xb8] sm:$0xff] }
  0x13   :  { %178 = vmatpush3.msra.mxu0 %v53_v5  ;;  %229 = vmatpush3.msra.mxu1 %v53_v5  ;;  %v47_v17 = vld [vmem:[#allocation3 + $0x38] sm:$0xff]  ;;  %v62_v18 = vld [vmem:[#allocation3 + $0xb0] sm:$0xff]  ;;  %v61_v20 = vld [vmem:[#allocation3 + $0xa8] sm:$0xff] }
  0x14   :  { %179 = vmatprep.subr.mxu0 %v68_v6  ;;  %214 = vmatprep.subr.mxu1 %v68_v6  ;;  %v46_v19 = vld [vmem:[#allocation3 + $0x30] sm:$0xff]  ;;  %v45_v21 = vld [vmem:[#allocation3 + $0x28] sm:$0xff]  ;;  %v60_v22 = vld [vmem:[#allocation3 + $0xa0] sm:$0xff] }
  0x15   :  { %180 = vmatpush3.msra.mxu0 %v52_v7  ;;  %230 = vmatpush3.msra.mxu1 %v52_v7  ;;  %v44_v23 = vld [vmem:[#allocation3 + $0x20] sm:$0xff]  ;;  %v59_v24 = vld [vmem:[#allocation3 + $0x98] sm:$0xff]  ;;  %v58_v26 = vld [vmem:[#allocation3 + $0x90] sm:$0xff] }
  0x16   :  { %181 = vmatprep.subr.mxu0 %v67_v8  ;;  %215 = vmatprep.subr.mxu1 %v67_v8  ;;  %v43_v25 = vld [vmem:[#allocation3 + $0x18] sm:$0xff]  ;;  %v42_v27 = vld [vmem:[#allocation3 + $0x10] sm:$0xff]  ;;  %v57_v28 = vld [vmem:[#allocation3 + $0x88] sm:$0xff] }
  0x17   :  { %182 = vmatpush3.msra.mxu0 %v51_v9  ;;  %231 = vmatpush3.msra.mxu1 %v51_v9  ;;  %v41_v29 = vld [vmem:[#allocation3 + $0x8] sm:$0xff]  ;;  %v56_v30 = vld [vmem:[#allocation3 + $0x80] sm:$0xff]  ;;  %v39_v33 = vld [vmem:[%s315_s0 + $0x18] sm:$0xff] }
  0x18   :  { %183 = vmatprep.subr.mxu0 %v66_v10  ;;  %216 = vmatprep.subr.mxu1 %v66_v10  ;;  %v40_v31 = vld [vmem:[#allocation3] sm:$0xff]  ;;  %v37_v32 = vld [vmem:[%s315_s0 + $0x8] sm:$0xff]  ;;  %v38_v35 = vld [vmem:[%s315_s0 + $0x10] sm:$0xff] }
  0x19   :  { %184 = vmatpush3.msra.mxu0 %v50_v11  ;;  %232 = vmatpush3.msra.mxu1 %v50_v11  ;;  %v36_v34 = vld [vmem:[%s315_s0] sm:$0xff] }
  0x1a   :  { %185 = vmatprep.subr.mxu0 %v65_v12  ;;  %217 = vmatprep.subr.mxu1 %v65_v12  ;;  %v172_v39 = vld [vmem:[%s317_s2] ss:$0 sm:$0xff] }
  0x1b   :  { %186 = vmatpush3.msra.mxu0 %v49_v13  ;;  %233 = vmatpush3.msra.mxu1 %v49_v13 }
  0x1c   :  { %187 = vmatprep.subr.mxu0 %v64_v14  ;;  %218 = vmatprep.subr.mxu1 %v64_v14 }
  0x1d   :  { %188 = vmatpush3.msra.mxu0 %v48_v15  ;;  %234 = vmatpush3.msra.mxu1 %v48_v15 }
  0x1e   :  { %189 = vmatprep.subr.mxu0 %v63_v16  ;;  %219 = vmatprep.subr.mxu1 %v63_v16 }
  0x1f   :  { %190 = vmatpush3.msra.mxu0 %v47_v17  ;;  %235 = vmatpush3.msra.mxu1 %v47_v17 }
  0x20   :  { %191 = vmatprep.subr.mxu0 %v62_v18  ;;  %220 = vmatprep.subr.mxu1 %v62_v18 }
  0x21   :  { %192 = vmatpush3.msra.mxu0 %v46_v19  ;;  %236 = vmatpush3.msra.mxu1 %v46_v19 }
  0x22   :  { %193 = vmatprep.subr.mxu0 %v61_v20  ;;  %221 = vmatprep.subr.mxu1 %v61_v20 }
  0x23   :  { %194 = vmatpush3.msra.mxu0 %v45_v21  ;;  %237 = vmatpush3.msra.mxu1 %v45_v21 }
  0x24   :  { %195 = vmatprep.subr.mxu0 %v60_v22  ;;  %222 = vmatprep.subr.mxu1 %v60_v22 }
  0x25   :  { %196 = vmatpush3.msra.mxu0 %v44_v23  ;;  %238 = vmatpush3.msra.mxu1 %v44_v23 }
  0x26   :  { %197 = vmatprep.subr.mxu0 %v59_v24  ;;  %223 = vmatprep.subr.mxu1 %v59_v24 }
  0x27   :  { %198 = vmatpush3.msra.mxu0 %v43_v25  ;;  %239 = vmatpush3.msra.mxu1 %v43_v25 }
  0x28   :  { %199 = vmatprep.subr.mxu0 %v58_v26  ;;  %224 = vmatprep.subr.mxu1 %v58_v26 }
  0x29   :  { %200 = vmatpush3.msra.mxu0 %v42_v27  ;;  %240 = vmatpush3.msra.mxu1 %v42_v27 }
  0x2a   :  { %201 = vmatprep.subr.mxu0 %v57_v28  ;;  %225 = vmatprep.subr.mxu1 %v57_v28 }
  0x2b   :  { %202 = vmatpush3.msra.mxu0 %v41_v29  ;;  %241 = vmatpush3.msra.mxu1 %v41_v29 }
  0x2c   :  { %203 = vmatprep.subr.mxu0 %v56_v30  ;;  %226 = vmatprep.subr.mxu1 %v56_v30 }
  0x2d   :  { %204 = vmatpush3.msra.mxu0 %v40_v31  ;;  %242 = vmatpush3.msra.mxu1 %v40_v31 }
  0x2e   :  { %136 = vmatprep.mubr.f32.mxu0 %v37_v32  ;;  %141 = vmatprep.mubr.f32.mxu1 %v39_v33 }
  0x2f   :  { %137 = vmatmul.mubr.f32.vlgmr.msra.gmra.mxu0 %v36_v34  ;;  %142 = vmatmul.mubr.f32.vlgmr.msra.gmra.mxu1 %v38_v35 }
  0xef   :  { %v205_v36 = vpop.f32.mrf.mxu0  ;;  %v208_v37 = vpop.f32.mrf.mxu1 }
  0xf1   :  { %v206_v38 = vpop.f32.mrf.mxu0  ;;  %v209_v40 = vpop.f32.mrf.mxu1 }
  0xf2   :  { %v207_v41 = vadd.f32 %v206_v38, %v205_v36  ;;  %v210_v42 = vadd.f32 %v209_v40, %v208_v37 }
  0xf4   :  { %v163_v43 = vadd.f32 %v207_v41, %v172_v39  ;;  %v164_v44 = vadd.f32 %v210_v42, %v172_v39 }
  0xf6   :  { %165 = vst [vmem:[%s318_s3] sm:$0xff] %v163_v43  ;;  %166 = vst [vmem:[%s318_s3 + $0x8] sm:$0xff] %v164_v44 }
  0xf7   :  { %171 = vsyncpa [#allocation4], 1 }

</bundles_post_ra>
